<compile_context>
chip_gen: v7x
topology: tpu7x:2x2x1
jax: 0.10.0
libtpu: 0.0.40
codegen_flags: <defaults>
</compile_context>

<pallas_src>
import jax
import jax.numpy as jnp
from jax import lax
from jax.experimental import pallas as pl
from jax.experimental.pallas import tpu as pltpu

EPS = 1e-5  # nn.BatchNorm2d default eps


def res_block_kernel(patch_ref, w2_ref, x_ref, gb_ref, out_ref):
    # patch_ref: (9C, N*HW) bf16  prebuilt im2col, rows ordered (kh, kw, cin)
    # w2_ref   : (C, 9C)    bf16  conv weight, columns ordered (kh, kw, cin)
    # x_ref    : (N, C, HW) f32   original input, channel-major per image
    # gb_ref   : (C, 2)     f32   columns = [gamma, beta]
    # out_ref  : (N, 2C, HW) f32  relu(concat([x, bn(conv(x))], channel))
    C = w2_ref.shape[0]
    N, _, HW = x_ref.shape
    inv_cnt = 1.0 / (N * HW)

    # Single MXU matmul for the entire batch (bf16 operands, f32 accumulate).
    conv = jnp.dot(w2_ref[...], patch_ref[...],
                   preferred_element_type=jnp.float32)            # (C, N*HW)

    # Training-mode BatchNorm statistics: two-pass, f32, biased variance.
    mean = jnp.sum(conv, axis=1, keepdims=True) * inv_cnt         # (C, 1)
    centered = conv - mean
    var = jnp.sum(centered * centered, axis=1, keepdims=True) * inv_cnt
    gamma = gb_ref[:, 0:1]                                        # (C, 1)
    beta = gb_ref[:, 1:2]                                         # (C, 1)
    scale = gamma * lax.rsqrt(var + EPS)                          # (C, 1)
    bn = centered * scale + beta                                  # (C, N*HW)

    # Per image: assemble the full (2C, HW) tile in registers and issue a
    # single unmasked full-tile store (2C = 8 sublanes, HW = 256 lanes).
    for n in range(N):                                            # static unroll
        x_n = x_ref[n]                                            # (C, HW)
        bn_n = bn[:, n * HW:(n + 1) * HW]                         # (C, HW)
        tile = jnp.concatenate([x_n, bn_n], axis=0)               # (2C, HW)
        out_ref[n] = jnp.maximum(tile, 0.0).astype(out_ref.dtype)


@jax.jit
def res_block_forward(x_nchw, w_oihw, gamma, beta):
    N, C, H, W = x_nchw.shape
    HW = H * W

    # Wrapper-side layout plumbing (XLA): reflect pad + lane-dense bf16 im2col.
    xpad = jnp.pad(x_nchw, ((0, 0), (0, 0), (1, 1), (1, 1)), mode="reflect")
    taps = [xpad[:, :, kh:kh + H, kw:kw + W]
            for kh in range(3) for kw in range(3)]                # 9 x (N,C,H,W)
    patch = jnp.stack(taps, axis=0)                               # (9, N, C, H, W)
    patch = jnp.transpose(patch, (0, 2, 1, 3, 4))                 # (9, C, N, H, W)
    patch = patch.reshape(9 * C, N * HW).astype(jnp.bfloat16)     # rows (kh,kw,cin)

    # (Cout, Cin, 3, 3) -> (Cout, 9*Cin), columns ordered (kh, kw, cin) to
    # match the patch row order; bf16 cast done once here, not per kernel step.
    w2 = jnp.transpose(w_oihw, (0, 2, 3, 1)).reshape(C, 9 * C).astype(jnp.bfloat16)

    x_flat = x_nchw.reshape(N, C, HW)        # free: input is already channel-major
    gb = jnp.stack([gamma, beta], axis=1).astype(jnp.float32)     # (C, 2)

    vmem = pl.BlockSpec(memory_space=pltpu.MemorySpace.VMEM)
    out = pl.pallas_call(
        res_block_kernel,
        out_shape=jax.ShapeDtypeStruct((N, 2 * C, HW), x_nchw.dtype),
        in_specs=[vmem, vmem, vmem, vmem],
        out_specs=vmem,
        # No grid: one step, whole batch resident in VMEM (~150 KB, far under
        # the default scoped-VMEM budget on v5e/v6e/v7x).
        # TODO(synk): for larger N*H*W, tile HW/batch with a "parallel" grid
        # axis (v7x: 2 TensorCores) and re-derive the VMEM budget (v7x: 64 MiB).
    )(patch, w2, x_flat, gb)

    # Lane-dense (N, 2C, H*W) -> (N, 2C, H, W): plain reshape, no transpose.
    return out.reshape(N, 2 * C, H, W)


def res_block_ref(x_nchw, w_oihw, gamma, beta):
    """Pure-JAX f32 reference (same math, no Pallas) for correctness checking."""
    xpad = jnp.pad(x_nchw, ((0, 0), (0, 0), (1, 1), (1, 1)), mode="reflect")
    conv = lax.conv_general_dilated(
        xpad, w_oihw, window_strides=(1, 1), padding="VALID",
        dimension_numbers=("NCHW", "OIHW", "NCHW"))
    mean = jnp.mean(conv, axis=(0, 2, 3), keepdims=True)
    var = jnp.mean((conv - mean) ** 2, axis=(0, 2, 3), keepdims=True)
    g = gamma.reshape(1, -1, 1, 1)
    b = beta.reshape(1, -1, 1, 1)
    bn = (conv - mean) * lax.rsqrt(var + EPS) * g + b
    return jnp.maximum(jnp.concatenate([x_nchw, bn], axis=1), 0.0)


if __name__ == "__main__":
    key = jax.random.PRNGKey(0)
    k_x, k_w, k_g, k_b = jax.random.split(key, 4)

    N, C, H, W = 2, 4, 16, 16
    x = jax.random.normal(k_x, (N, C, H, W), dtype=jnp.float32)

    # Parameters as a ResBlock(channels=4) would have them: conv.weight
    # (Cout, Cin, 3, 3) with no bias; BN affine params (here mildly perturbed
    # from the fresh gamma=1 / beta=0 init to exercise the affine path).
    w = 0.1 * jax.random.normal(k_w, (C, C, 3, 3), dtype=jnp.float32)
    gamma = 1.0 + 0.1 * jax.random.normal(k_g, (C,), dtype=jnp.float32)
    beta = 0.1 * jax.random.normal(k_b, (C,), dtype=jnp.float32)

    out = jax.block_until_ready(res_block_forward(x, w, gamma, beta))

    ref = res_block_ref(x, w, gamma, beta)
    assert out.shape == (N, 2 * C, H, W), out.shape
    # bf16 MXU operands (f32 accumulation) => slightly looser tolerance than f32.
    err = float(jnp.max(jnp.abs(out - ref)))
    assert jnp.allclose(out, ref, atol=5e-2, rtol=5e-2), err

    print("KERNEL_OK")
</pallas_src>

<mosaic_0001>
module attributes {stable_mosaic.version = 11 : i64} {
  func.func @res_block_kernel(%arg0: memref<36x512xbf16, #tpu.memory_space<vmem>>, %arg1: memref<4x36xbf16, #tpu.memory_space<vmem>>, %arg2: memref<2x4x256xf32, #tpu.memory_space<vmem>>, %arg3: memref<4x2xf32, #tpu.memory_space<vmem>>, %arg4: memref<2x8x256xf32, #tpu.memory_space<vmem>>) attributes {dimension_semantics = [], scalar_prefetch = 0 : i64, scratch_operands = 0 : i64, tpu.core_type = #tpu.core_type<tc>} {
    %c0 = arith.constant 0 : index
    %c0_0 = arith.constant 0 : index
    %0 = vector.load %arg1[%c0, %c0_0] : memref<4x36xbf16, #tpu.memory_space<vmem>>, vector<4x36xbf16>
    %c0_1 = arith.constant 0 : index
    %c0_2 = arith.constant 0 : index
    %1 = vector.load %arg0[%c0_1, %c0_2] : memref<36x512xbf16, #tpu.memory_space<vmem>>, vector<36x512xbf16>
    %cst = arith.constant dense<0.000000e+00> : vector<4x512xf32>
    %2 = tpu.matmul %0, %1, %cst {dimension_numbers = #tpu.dot_dimension_numbers<[1], [0], [0], [1], [0, 0, 1, 1], [], []>} : vector<4x36xbf16>, vector<36x512xbf16>, vector<4x512xf32> -> vector<4x512xf32>
    %cst_3 = arith.constant dense<0.000000e+00> : vector<4xf32>
    %3 = vector.multi_reduction <add>, %2, %cst_3 [1] : vector<4x512xf32> to vector<4xf32>
    %4 = vector.shape_cast %3 : vector<4xf32> to vector<4x1xf32>
    %cst_4 = arith.constant 0.001953125 : f32
    %5 = vector.broadcast %cst_4 : f32 to vector<4x1xf32>
    %6 = arith.mulf %4, %5 : vector<4x1xf32>
    %7 = vector.broadcast %6 : vector<4x1xf32> to vector<4x512xf32>
    %8 = arith.subf %2, %7 : vector<4x512xf32>
    %9 = arith.mulf %8, %8 : vector<4x512xf32>
    %cst_5 = arith.constant dense<0.000000e+00> : vector<4xf32>
    %10 = vector.multi_reduction <add>, %9, %cst_5 [1] : vector<4x512xf32> to vector<4xf32>
    %11 = vector.shape_cast %10 : vector<4xf32> to vector<4x1xf32>
    %cst_6 = arith.constant 0.001953125 : f32
    %12 = vector.broadcast %cst_6 : f32 to vector<4x1xf32>
    %13 = arith.mulf %11, %12 : vector<4x1xf32>
    %c0_7 = arith.constant 0 : index
    %c0_8 = arith.constant 0 : index
    %14 = vector.load %arg3[%c0_7, %c0_8] : memref<4x2xf32, #tpu.memory_space<vmem>>, vector<4x1xf32>
    %c0_9 = arith.constant 0 : index
    %c1 = arith.constant 1 : index
    %15 = vector.load %arg3[%c0_9, %c1] : memref<4x2xf32, #tpu.memory_space<vmem>>, vector<4x1xf32>
    %cst_10 = arith.constant 9.99999974E-6 : f32
    %16 = vector.broadcast %cst_10 : f32 to vector<4x1xf32>
    %17 = arith.addf %13, %16 : vector<4x1xf32>
    %18 = math.rsqrt %17 : vector<4x1xf32>
    %19 = arith.mulf %14, %18 : vector<4x1xf32>
    %20 = vector.broadcast %19 : vector<4x1xf32> to vector<4x512xf32>
    %21 = arith.mulf %8, %20 : vector<4x512xf32>
    %22 = vector.broadcast %15 : vector<4x1xf32> to vector<4x512xf32>
    %23 = arith.addf %21, %22 : vector<4x512xf32>
    %c0_11 = arith.constant 0 : index
    %c0_12 = arith.constant 0 : index
    %c0_13 = arith.constant 0 : index
    %24 = vector.load %arg2[%c0_11, %c0_12, %c0_13] : memref<2x4x256xf32, #tpu.memory_space<vmem>>, vector<1x4x256xf32>
    %25 = vector.shape_cast %24 : vector<1x4x256xf32> to vector<4x256xf32>
    %26 = vector.extract_strided_slice %23 {offsets = [0, 0], sizes = [4, 256], strides = [1, 1]} : vector<4x512xf32> to vector<4x256xf32>
    %27 = tpu.concatenate %25, %26 in 0 : vector<4x256xf32>, vector<4x256xf32> -> vector<8x256xf32>
    %cst_14 = arith.constant 0.000000e+00 : f32
    %28 = vector.broadcast %cst_14 : f32 to vector<8x256xf32>
    %29 = arith.maximumf %27, %28 : vector<8x256xf32>
    %c0_15 = arith.constant 0 : index
    %c0_16 = arith.constant 0 : index
    %c0_17 = arith.constant 0 : index
    %30 = vector.load %arg4[%c0_15, %c0_16, %c0_17] : memref<2x8x256xf32, #tpu.memory_space<vmem>>, vector<1x8x256xf32>
    %31 = vector.shape_cast %30 : vector<1x8x256xf32> to vector<8x256xf32>
    %32 = vector.shape_cast %29 : vector<8x256xf32> to vector<1x8x256xf32>
    tpu.vector_store %arg4[%c0_15, %c0_16, %c0_17], %32 {strides = array<i32>} : memref<2x8x256xf32, #tpu.memory_space<vmem>>, vector<1x8x256xf32>,
    %c1_18 = arith.constant 1 : index
    %c0_19 = arith.constant 0 : index
    %c0_20 = arith.constant 0 : index
    %33 = vector.load %arg2[%c1_18, %c0_19, %c0_20] : memref<2x4x256xf32, #tpu.memory_space<vmem>>, vector<1x4x256xf32>
    %34 = vector.shape_cast %33 : vector<1x4x256xf32> to vector<4x256xf32>
    %35 = vector.extract_strided_slice %23 {offsets = [0, 256], sizes = [4, 256], strides = [1, 1]} : vector<4x512xf32> to vector<4x256xf32>
    %36 = tpu.concatenate %34, %35 in 0 : vector<4x256xf32>, vector<4x256xf32> -> vector<8x256xf32>
    %cst_21 = arith.constant 0.000000e+00 : f32
    %37 = vector.broadcast %cst_21 : f32 to vector<8x256xf32>
    %38 = arith.maximumf %36, %37 : vector<8x256xf32>
    %c1_22 = arith.constant 1 : index
    %c0_23 = arith.constant 0 : index
    %c0_24 = arith.constant 0 : index
    %39 = vector.load %arg4[%c1_22, %c0_23, %c0_24] : memref<2x8x256xf32, #tpu.memory_space<vmem>>, vector<1x8x256xf32>
    %40 = vector.shape_cast %39 : vector<1x8x256xf32> to vector<8x256xf32>
    %41 = vector.shape_cast %38 : vector<8x256xf32> to vector<1x8x256xf32>
    tpu.vector_store %arg4[%c1_22, %c0_23, %c0_24], %41 {strides = array<i32>} : memref<2x8x256xf32, #tpu.memory_space<vmem>>, vector<1x8x256xf32>,
    return
  }
}

</mosaic_0001>

<bundles_post_ra>
// kernel: res_block_forward.1
= control target key start
LH: loop header
LB: loop body
LE: loop exit
PB: predicated region body
PF: predicated region fallthrough
CT: control target
= control target key end

     0   :  { %v311_v1 = vmov 0   ;;  %vm83_vm0 = vcmask 1041408   ;;  %vm79_vm1 = vcmask 293888   ;;  %vm178_vm2 = vcmask 1043456   ;;  %s404_s0 = inlined_call_operand.vmem [shape: bf16[36,512], index: 0, kind: input, shape index: {}]   ;;  %s405_s1 = inlined_call_operand.vmem [shape: bf16[4,36], index: 1, kind: input, shape index: {}]   ;;  %s406_s3 = inlined_call_operand.vmem [shape: f32[4,2], index: 3, kind: input, shape index: {}]   ;;  %s407_s2 = inlined_call_operand.vmem [shape: f32[2,4,256], index: 2, kind: input, shape index: {}]   ;;  %s408_s4 = inlined_call_operand.vmem [shape: f32[2,8,256], index: 4, kind: output, shape index: {}]  }
   0x1   :  { %v291_v0 = vld [vmem:[%s404_s0 + $0x4] ss:$16 sps:$4 sm:$0xff]   ;;  %128 = vmatprep.mubr.bf16.mxu0 %v311_v1  ;;  %169 = vmatprep.mubr.bf16.mxu1 %v311_v1  ;;  %v293_v2 = vld [vmem:[%s404_s0 + $0xc] ss:$16 sps:$4 sm:$0xff]   ;;  %v295_v3 = vld [vmem:[%s404_s0] ss:$16 sps:$4 sm:$0xff]  }
   0x2   :  { %288 = vset.pattern.permute.xlu1 %v311_v1  ;;  %96 = vmatprep.subr.bf16.mxu0 %v291_v0  ;;  %v296_v4 = vld [vmem:[%s404_s0 + $0x8] ss:$16 sps:$4 sm:$0xff]   ;;  %v297_v5 = vld [vmem:[%s404_s0 + $0x24] ss:$16 sps:$4 sm:$0xff]   ;;  %v299_v6 = vld [vmem:[%s404_s0 + $0x2c] ss:$16 sps:$4 sm:$0xff]  }
   0x3   :  { %137 = vmatprep.subr.bf16.mxu1 %v293_v2  ;;  %97 = vmatpush1.bf16.msra.mxu0 %v295_v3  ;;  %v301_v7 = vld [vmem:[%s404_s0 + $0x20] ss:$16 sps:$4 sm:$0xff]   ;;  %v302_v8 = vld [vmem:[%s404_s0 + $0x28] ss:$16 sps:$4 sm:$0xff]   ;;  %v312_v50 = vmov 1  }
   0x4   :  { %138 = vmatpush1.bf16.msra.mxu1 %v296_v4  ;;  %98 = vmatprep.subr.bf16.mxu0 %v297_v5  ;;  %v27_v9 = vld [vmem:[%s404_s0 + $0x40] sm:$0x33]  ;;  %v28_v10 = vld [vmem:[%s404_s0 + $0x48] sm:$0x33] }
   0x5   :  { %139 = vmatprep.subr.bf16.mxu1 %v299_v6  ;;  %v276_v11 = vcombine.high %v27_v9, %v27_v9  ;;  %v278_v12 = vcombine.high %v28_v10, %v28_v10  ;;  %v275_v13 = vcombine.low %v27_v9, %v27_v9  ;;  %v277_v14 = vcombine.low %v28_v10, %v28_v10  ;;  %v18_v17 = vld [vmem:[%s405_s1] sm:$0x3]  ;;  %v283_v59 = vld [vmem:[%s407_s2 + $0x8] sm:$0xff] }
   0x6   :  { %290 = vset.pattern.permute.xlu0 %v312_v50  ;;  %v207_v54 = vld [vmem:[%s406_s3] sm:$0xf]  ;;  %v248_v1 = vcombine.high %v283_v59, %v283_v59 }
   0x7   :  { %99 = vmatpush1.bf16.msra.mxu0 %v301_v7  ;;  %v85_v15 = vsel %vm83_vm0, %v275_v13, 0  ;;  %v91_v16 = vsel %vm83_vm0, %v277_v14, 0  ;;  %v229_v58 = vld [vmem:[%s407_s2] sm:$0xff] }
   0x8   :  { %140 = vmatpush1.bf16.msra.mxu1 %v302_v8  ;;  %279 = vmatprep.subr.msk.bf16.mxu0 %vm83_vm0, %v276_v11  ;;  %v231_v0 = vcombine.high %v229_v58, %v229_v58 }
   0x9   :  { %281 = vmatprep.subr.msk.bf16.mxu1 %vm83_vm0, %v278_v12 }
   0xb   :  { %101 = vmatpush1.bf16.msra.mxu0 %v85_v15 }
   0xc   :  { %142 = vmatpush1.bf16.msra.mxu1 %v91_v16 }
   0xe   :  { %280 = vmatmul.mubr.msk.bf16.vlgmr.msra.gmra.mrb[0].mxu0 %vm79_vm1, %v18_v17 }
   0xf   :  { %282 = vmatmul.mubr.msk.bf16.vlgmr.msra.gmra.mrb[0].mxu1 %vm79_vm1, %v18_v17 }
  0xe1   :  { %v130_v18 = vpop.f32.mrb[0].mxu0 }
  0xe2   :  { %v171_v19 = vpop.f32.mrb[0].mxu1  ;;  %v179_v20 = vsel %vm178_vm2, %v130_v18, 0.0  ;;  %v132_v21 = vpop.f32.mrb[1].mxu0 }
  0xe3   :  { %v173_v22 = vpop.f32.mrb[1].mxu1  ;;  %v182_v23 = vsel %vm178_vm2, %v171_v19, 0.0  ;;  %v180_v24 = vsel %vm178_vm2, %v132_v21, 0.0  ;;  %v134_v25 = vpop.f32.mrb[2].mxu0 }
  0xe4   :  { %v175_v26 = vpop.f32.mrb[2].mxu1  ;;  %v181_v27 = vadd.f32 %v180_v24, %v179_v20  ;;  %v135_v28 = vpop.f32.mrb[3].mxu0  ;;  %v184_v31 = vsel %vm178_vm2, %v173_v22, 0.0 }
  0xe5   :  { %v176_v29 = vpop.f32.mrb[3].mxu1 }
  0xe6   :  { %v183_v30 = vadd.f32 %v182_v23, %v181_v27 }
  0xe8   :  { %v185_v32 = vadd.f32 %v184_v31, %v183_v30 }
  0xea   :  { %186 = vadd.xlane.f32.xlu0 %v185_v32 }
 0x177   :  { %v187_v33 = vpop.xlane.xlu0 %186 }
 0x178   :  { %v188_v34 = vmul.f32 0.001953125, %v187_v33 }
 0x17a   :  { %v189_v35 = vsub.f32 %v130_v18, %v188_v34  ;;  %v190_v36 = vsub.f32 %v132_v21, %v188_v34  ;;  %v191_v37 = vsub.f32 %v171_v19, %v188_v34  ;;  %v192_v38 = vsub.f32 %v173_v22, %v188_v34 }
 0x17c   :  { %v193_v39 = vmul.f32 %v189_v35, %v189_v35  ;;  %v194_v40 = vmul.f32 %v190_v36, %v190_v36  ;;  %v195_v41 = vmul.f32 %v191_v37, %v191_v37  ;;  %v196_v42 = vmul.f32 %v192_v38, %v192_v38 }
 0x17e   :  { %v197_v43 = vsel %vm178_vm2, %v193_v39, 0.0  ;;  %v198_v44 = vsel %vm178_vm2, %v194_v40, 0.0  ;;  %v200_v46 = vsel %vm178_vm2, %v195_v41, 0.0  ;;  %v202_v48 = vsel %vm178_vm2, %v196_v42, 0.0 }
 0x17f   :  { %v199_v45 = vadd.f32 %v198_v44, %v197_v43 }
 0x181   :  { %v201_v47 = vadd.f32 %v200_v46, %v199_v45 }
 0x183   :  { %v203_v49 = vadd.f32 %v202_v48, %v201_v47 }
 0x185   :  { %204 = vadd.xlane.f32.xlu0 %v203_v49 }
 0x212   :  { %v205_v51 = vpop.xlane.xlu0 %204 }
 0x213   :  { %v206_v52 = vmul.f32 0.001953125, %v205_v51 }
 0x215   :  { %v208_v53 = vadd.f32 1e-05, %v206_v52 }
 0x217   :  { %309 = vrsqrt.f32 %v208_v53 }
 0x221   :  { %v310_v55 = vpop.eup %309 }
 0x222   :  { %v210_v56 = vmul.f32 %v310_v55, %v207_v54 }
 0x224   :  { %213 = vperm.xlu1 %288, %v210_v56  }
 0x228   :  { %289 = vset.pattern.permute.xlu1 %v312_v50 }
 0x229   :  { %222 = vperm.xlu1 %289, %v207_v54  }
 0x2a3   :  { %v214_v57 = vpop.permute.xlu1 %213 }
 0x2a4   :  { %v216_v60 = vmul.f32 %v214_v57, %v189_v35  ;;  %v217_v61 = vmul.f32 %v214_v57, %v190_v36  ;;  %v218_v62 = vmul.f32 %v214_v57, %v191_v37  ;;  %v219_v63 = vmul.f32 %v214_v57, %v192_v38 }
 0x2a8   :  { %v223_v2 = vpop.permute.xlu1 %222 }
 0x2a9   :  { %v225_v3 = vadd.f32 %v223_v2, %v216_v60  ;;  %v226_v4 = vadd.f32 %v223_v2, %v217_v61  ;;  %v227_v5 = vadd.f32 %v223_v2, %v218_v62  ;;  %v228_v6 = vadd.f32 %v223_v2, %v219_v63 }
 0x2ab   :  { %v235_v7 = vrot.slane %v225_v3, 4  ;;  %v236_v8 = vrot.slane %v226_v4, 4  ;;  %v252_v9 = vrot.slane %v227_v5, 4  ;;  %v253_v10 = vrot.slane %v228_v6, 4 }
 0x2ad   :  { %v239_v11 = vsel %vm178_vm2, %v229_v58, %v235_v7  ;;  %v240_v12 = vsel %vm178_vm2, %v231_v0, %v236_v8  ;;  %v256_v13 = vsel %vm178_vm2, %v283_v59, %v252_v9  ;;  %v257_v14 = vsel %vm178_vm2, %v248_v1, %v253_v10 }
 0x2ae   :  { %v241_v15 = vmax.f32 %v239_v11, 0.0  ;;  %v242_v16 = vmax.f32 %v240_v12, 0.0  ;;  %v258_v17 = vmax.f32 %v256_v13, 0.0  ;;  %v259_v18 = vmax.f32 %v257_v14, 0.0 }
 0x2b0   :  { %243 = vst [vmem:[%s408_s4] sm:$0xff] %v241_v15  ;;  %244 = vst [vmem:[%s408_s4 + $0x8] sm:$0xff] %v242_v16 }
 0x2b1   :  { %284 = vst [vmem:[%s408_s4 + $0x10] sm:$0xff] %v258_v17  ;;  %285 = vst [vmem:[%s408_s4 + $0x18] sm:$0xff] %v259_v18 }

</bundles_post_ra>
